<compile_context>
chip_gen: v5e
topology: v5e:2x2
jax: 0.10.0
libtpu: 0.0.40
codegen_flags: <defaults>
</compile_context>

<pallas_src>
import functools

import jax
import jax.numpy as jnp
from jax import lax
from jax.experimental import pallas as pl
from jax.experimental.pallas import tpu as pltpu

V_THRESH = 1.0  # spikingjelly IFNode default v_threshold


def _basic_block_kernel(x_ref, w_ref, b_ref, o_ref, pad_ref, *, T, H, WC):
    """One batch sample per grid step, lane-dense fused (W*C) layout.

    x_ref  : (T, 1, H, WC)    input block, WC = W * Cin (128-lane dense)
    w_ref  : (2, 3*WC, WC)    BN-scale-folded, width-banded, kh-concatenated weights
    b_ref  : (2, WC)          folded BN bias, tiled over W
    o_ref  : (1, H, WC)       per-sample output (T-broadcast done by the caller)
    pad_ref: (H+2, WC)        VMEM scratch shared by both convs (row halo = 0)
    """
    x = x_ref[:, 0]                                          # (T, H, WC), loaded once
    inv_t = 1.0 / T

    # ---- sn1 mean + residual mean: both reductions from a single load of x ----
    m1 = jnp.sum((x >= V_THRESH).astype(jnp.float32), axis=0) * inv_t   # [H, WC]
    mean_x = jnp.sum(x, axis=0) * inv_t                                 # [H, WC]

    # Zero only the two halo rows each step (2 x 128 lanes).  The interior is
    # fully overwritten by each conv.  Not gated on program_id == 0 because the
    # grid is megacore-parallel and each core owns its own scratch.
    zero_row = jnp.zeros((1, WC), jnp.float32)
    pad_ref[0:1, :] = zero_row
    pad_ref[H + 1:H + 2, :] = zero_row

    def conv3x3_bn(m, idx):
        # 3x3 conv (stride 1, pad 1): the +/-1 width shift and C->P channel mixing
        # live inside the banded weight matrix; the +/-1 row shift goes through the
        # padded scratch.  The three kh taps are concatenated on the lane axis so
        # each conv is a single (H, 3*WC) x (3*WC, WC) f32 matmul.
        pad_ref[1:H + 1, :] = m
        patches = jnp.concatenate(
            [pad_ref[kh:kh + H, :] for kh in range(3)], axis=-1)        # (H, 3*WC)
        y = jnp.dot(patches, w_ref[idx], preferred_element_type=jnp.float32)
        return y + b_ref[idx, :]                                        # BN bias

    y1 = conv3x3_bn(m1, 0)
    # sn2 on expand(T, ...) then mean over T: identical per step -> heaviside.
    m2 = (y1 >= V_THRESH).astype(jnp.float32)
    y2 = conv3x3_bn(m2, 1)

    # ---- residual: out = y2 + mean_T(x); T-broadcast handled by the wrapper ----
    o_ref[0] = y2 + mean_x


def _banded_weights(w_hwio, W):
    """Fold 3x3 HWIO weights into width-banded matrices.

    Returns B of shape (3, W*C, W*P) with
      B[kh, w*C + c, w'*P + p] = w_hwio[kh, w - w' + 1, c, p]  (0 if out of band)
    so that conv3x3(x)[h', :] = sum_kh x_fused[h'+kh-1, :] @ B[kh].
    """
    _, _, C, P = w_hwio.shape
    pos = jnp.arange(W)
    k = jnp.arange(3)
    # band[k, a, b] = 1 iff a == b + k - 1   (a: input width, b: output width)
    band = (pos[None, :, None] == (pos[None, None, :] + k[:, None, None] - 1))
    band = band.astype(jnp.float32)
    B = jnp.einsum('kab,hkcp->hacbp', band, w_hwio.astype(jnp.float32))
    return B.reshape(3, W * C, W * P)


def basic_block_qs(x, w1, scale1, bias1, w2, scale2, bias2):
    """x: [T, N, H, W, Cin]; weights HWIO (3,3,Cin,P); folded-BN scale/bias per channel."""
    T, N, H, W, Cin = x.shape
    P = w1.shape[-1]
    assert Cin == P, "downsample=None path requires inplanes == planes"
    WC = W * Cin
    assert WC % 128 == 0 and H % 8 == 0, "lane-dense layout needs W*C % 128 == 0, H % 8 == 0"

    # Lane-dense layout: fold W and C into the lane axis (pure reshape, no copy).
    x_f = x.reshape(T, N, H, WC)

    def fold(w, scale):
        # BN scale folded into the conv weights; kh taps stacked along K.
        wb = _banded_weights(w, W) * jnp.tile(scale.astype(jnp.float32), W)[None, None, :]
        return wb.reshape(3 * WC, WC)

    w_cat = jnp.stack([fold(w1, scale1), fold(w2, scale2)])                    # [2, 3*WC, WC]
    b_cat = jnp.stack([jnp.tile(bias1, W), jnp.tile(bias2, W)]).astype(jnp.float32)  # [2, WC]

    kernel = functools.partial(_basic_block_kernel, T=T, H=H, WC=WC)
    out_f = pl.pallas_call(
        kernel,
        out_shape=jax.ShapeDtypeStruct((N, H, WC), jnp.float32),
        grid_spec=pltpu.PrefetchScalarGridSpec(
            num_scalar_prefetch=0,
            grid=(N,),
            in_specs=[
                pl.BlockSpec((T, 1, H, WC), lambda n: (0, n, 0, 0)),
                pl.BlockSpec((2, 3 * WC, WC), lambda n: (0, 0, 0)),
                pl.BlockSpec((2, WC), lambda n: (0, 0)),
            ],
            out_specs=pl.BlockSpec((1, H, WC), lambda n: (n, 0, 0)),
            scratch_shapes=[
                pltpu.VMEM((H + 2, WC), jnp.float32),   # padded conv input, reused by both convs
            ],
        ),
        compiler_params=pltpu.CompilerParams(
            dimension_semantics=("parallel",),
            vmem_limit_bytes=32 * 1024 * 1024),
    )(x_f, w_cat, b_cat)

    out = out_f.reshape(N, H, W, P)
    # T-broadcast outside the kernel: no redundant HBM writeback of T identical copies.
    return jnp.broadcast_to(out[None], (T, N, H, W, P))


def _reference(x, w1, scale1, bias1, w2, scale2, bias2):
    """Pure-JAX reference for the same NHWC layout."""
    T = x.shape[0]
    m1 = (x >= V_THRESH).astype(jnp.float32).mean(0)         # [N, H, W, Cin]
    y1 = lax.conv_general_dilated(m1, w1, (1, 1), 'SAME',
                                  dimension_numbers=('NHWC', 'HWIO', 'NHWC'))
    y1 = y1 * scale1 + bias1
    m2 = (y1 >= V_THRESH).astype(jnp.float32)
    y2 = lax.conv_general_dilated(m2, w2, (1, 1), 'SAME',
                                  dimension_numbers=('NHWC', 'HWIO', 'NHWC'))
    y2 = y2 * scale2 + bias2
    out = y2 + x.mean(0)
    return jnp.broadcast_to(out[None], (T,) + out.shape)


if __name__ == "__main__":
    T, N, H, W = 4, 2, 16, 16
    Cin = P = 8  # inplanes == planes (downsample=None path); W * Cin = 128 lanes

    keys = jax.random.split(jax.random.PRNGKey(0), 12)

    # PyTorch-layout input [T, N, C, H, W] -> kernel layout [T, N, H, W, C]
    x_tnchw = jax.random.normal(keys[0], (T, N, Cin, H, W), jnp.float32) * 1.5
    x = jnp.transpose(x_tnchw, (0, 1, 3, 4, 2))

    # conv3x3 weights (PyTorch OIHW) -> HWIO
    w1_oihw = jax.random.normal(keys[1], (P, Cin, 3, 3), jnp.float32) * 0.3
    w2_oihw = jax.random.normal(keys[2], (P, P, 3, 3), jnp.float32) * 0.3
    w1 = jnp.transpose(w1_oihw, (2, 3, 1, 0))
    w2 = jnp.transpose(w2_oihw, (2, 3, 1, 0))

    # BatchNorm2d parameters (eval mode), folded to scale/bias
    eps = 1e-5
    g1 = 1.0 + 0.1 * jax.random.normal(keys[3], (P,), jnp.float32)
    b1 = 0.1 * jax.random.normal(keys[4], (P,), jnp.float32)
    rm1 = 0.1 * jax.random.normal(keys[5], (P,), jnp.float32)
    rv1 = jnp.abs(1.0 + 0.1 * jax.random.normal(keys[6], (P,), jnp.float32))
    g2 = 1.0 + 0.1 * jax.random.normal(keys[7], (P,), jnp.float32)
    b2 = 0.1 * jax.random.normal(keys[8], (P,), jnp.float32)
    rm2 = 0.1 * jax.random.normal(keys[9], (P,), jnp.float32)
    rv2 = jnp.abs(1.0 + 0.1 * jax.random.normal(keys[10], (P,), jnp.float32))
    scale1 = g1 / jnp.sqrt(rv1 + eps)
    bias1 = b1 - rm1 * scale1
    scale2 = g2 / jnp.sqrt(rv2 + eps)
    bias2 = b2 - rm2 * scale2

    out = basic_block_qs(x, w1, scale1, bias1, w2, scale2, bias2)
    out = jax.block_until_ready(out)

    ref = _reference(x, w1, scale1, bias1, w2, scale2, bias2)
    assert out.shape == (T, N, H, W, P), out.shape
    assert jnp.allclose(out, ref, atol=1e-4, rtol=1e-4), \
        float(jnp.max(jnp.abs(out - ref)))

    print("KERNEL_OK")
</pallas_src>

<mosaic_0001>
module attributes {stable_mosaic.version = 11 : i64} {
  func.func @_basic_block_kernel(%arg0: i32, %arg1: memref<4x1x16x128xf32, #tpu.memory_space<vmem>>, %arg2: memref<2x384x128xf32, #tpu.memory_space<vmem>>, %arg3: memref<2x128xf32, #tpu.memory_space<vmem>>, %arg4: memref<1x16x128xf32, #tpu.memory_space<vmem>>, %arg5: memref<18x128xf32, #tpu.memory_space<vmem>>) attributes {dimension_semantics = [#tpu.dimension_semantics<parallel>], iteration_bounds = array<i64: 2>, scalar_prefetch = 0 : i64, scratch_operands = 1 : i64, tpu.core_type = #tpu.core_type<tc>, window_params = [{transform_indices = @transform_0, window_bounds = array<i64: 4, 1, 16, 128>}, {pipeline_mode = #tpu.pipeline_mode<synchronous>, transform_indices = @transform_1, window_bounds = array<i64: 2, 384, 128>}, {pipeline_mode = #tpu.pipeline_mode<synchronous>, transform_indices = @transform_2, window_bounds = array<i64: 2, 128>}, {transform_indices = @transform_3, window_bounds = array<i64: 1, 16, 128>}]} {
    %c0 = arith.constant 0 : index
    %c0_0 = arith.constant 0 : index
    %c0_1 = arith.constant 0 : index
    %c0_2 = arith.constant 0 : index
    %0 = vector.load %arg1[%c0, %c0_0, %c0_1, %c0_2] : memref<4x1x16x128xf32, #tpu.memory_space<vmem>>, vector<4x1x16x128xf32>
    %1 = vector.shape_cast %0 : vector<4x1x16x128xf32> to vector<4x16x128xf32>
    %cst = arith.constant 1.000000e+00 : f32
    %2 = vector.broadcast %cst : f32 to vector<4x16x128xf32>
    %3 = arith.cmpf oge, %1, %2 : vector<4x16x128xf32>
    %4 = arith.extui %3 : vector<4x16x128xi1> to vector<4x16x128xi32>
    %5 = arith.sitofp %4 : vector<4x16x128xi32> to vector<4x16x128xf32>
    %cst_3 = arith.constant dense<0.000000e+00> : vector<16x128xf32>
    %6 = vector.multi_reduction <add>, %5, %cst_3 [0] : vector<4x16x128xf32> to vector<16x128xf32>
    %cst_4 = arith.constant 2.500000e-01 : f32
    %7 = vector.broadcast %cst_4 : f32 to vector<16x128xf32>
    %8 = arith.mulf %6, %7 : vector<16x128xf32>
    %cst_5 = arith.constant dense<0.000000e+00> : vector<16x128xf32>
    %9 = vector.multi_reduction <add>, %1, %cst_5 [0] : vector<4x16x128xf32> to vector<16x128xf32>
    %cst_6 = arith.constant 2.500000e-01 : f32
    %10 = vector.broadcast %cst_6 : f32 to vector<16x128xf32>
    %11 = arith.mulf %9, %10 : vector<16x128xf32>
    %cst_7 = arith.constant 0.000000e+00 : f32
    %12 = vector.broadcast %cst_7 : f32 to vector<1x128xf32>
    %c0_8 = arith.constant 0 : index
    %c0_9 = arith.constant 0 : index
    %13 = vector.load %arg5[%c0_8, %c0_9] : memref<18x128xf32, #tpu.memory_space<vmem>>, vector<1x128xf32>
    tpu.vector_store %arg5[%c0_8, %c0_9], %12 {strides = array<i32>} : memref<18x128xf32, #tpu.memory_space<vmem>>, vector<1x128xf32>,
    %c17 = arith.constant 17 : index
    %c0_10 = arith.constant 0 : index
    %14 = vector.load %arg5[%c17, %c0_10] : memref<18x128xf32, #tpu.memory_space<vmem>>, vector<1x128xf32>
    tpu.vector_store %arg5[%c17, %c0_10], %12 {strides = array<i32>} : memref<18x128xf32, #tpu.memory_space<vmem>>, vector<1x128xf32>,
    %c1 = arith.constant 1 : index
    %c0_11 = arith.constant 0 : index
    %15 = vector.load %arg5[%c1, %c0_11] : memref<18x128xf32, #tpu.memory_space<vmem>>, vector<16x128xf32>
    tpu.vector_store %arg5[%c1, %c0_11], %8 {strides = array<i32>} : memref<18x128xf32, #tpu.memory_space<vmem>>, vector<16x128xf32>,
    %c0_12 = arith.constant 0 : index
    %c0_13 = arith.constant 0 : index
    %16 = vector.load %arg5[%c0_12, %c0_13] : memref<18x128xf32, #tpu.memory_space<vmem>>, vector<16x128xf32>
    %c1_14 = arith.constant 1 : index
    %c0_15 = arith.constant 0 : index
    %17 = vector.load %arg5[%c1_14, %c0_15] : memref<18x128xf32, #tpu.memory_space<vmem>>, vector<16x128xf32>
    %c2 = arith.constant 2 : index
    %c0_16 = arith.constant 0 : index
    %18 = vector.load %arg5[%c2, %c0_16] : memref<18x128xf32, #tpu.memory_space<vmem>>, vector<16x128xf32>
    %19 = tpu.concatenate %16, %17, %18 in 1 : vector<16x128xf32>, vector<16x128xf32>, vector<16x128xf32> -> vector<16x384xf32>
    %c0_17 = arith.constant 0 : index
    %c0_18 = arith.constant 0 : index
    %c0_19 = arith.constant 0 : index
    %20 = vector.load %arg2[%c0_17, %c0_18, %c0_19] : memref<2x384x128xf32, #tpu.memory_space<vmem>>, vector<1x384x128xf32>
    %21 = vector.shape_cast %20 : vector<1x384x128xf32> to vector<384x128xf32>
    %cst_20 = arith.constant dense<0.000000e+00> : vector<16x128xf32>
    %22 = tpu.matmul %19, %21, %cst_20 {dimension_numbers = #tpu.dot_dimension_numbers<[1], [0], [0], [1], [0, 0, 1, 1], [], []>} : vector<16x384xf32>, vector<384x128xf32>, vector<16x128xf32> -> vector<16x128xf32>
    %c0_21 = arith.constant 0 : index
    %c0_22 = arith.constant 0 : index
    %23 = vector.load %arg3[%c0_21, %c0_22] : memref<2x128xf32, #tpu.memory_space<vmem>>, vector<1x128xf32>
    %24 = vector.shape_cast %23 : vector<1x128xf32> to vector<128xf32>
    %25 = vector.shape_cast %24 : vector<128xf32> to vector<1x128xf32>
    %26 = vector.broadcast %25 : vector<1x128xf32> to vector<16x128xf32>
    %27 = arith.addf %22, %26 : vector<16x128xf32>
    %cst_23 = arith.constant 1.000000e+00 : f32
    %28 = vector.broadcast %cst_23 : f32 to vector<16x128xf32>
    %29 = arith.cmpf oge, %27, %28 : vector<16x128xf32>
    %30 = arith.extui %29 : vector<16x128xi1> to vector<16x128xi32>
    %31 = arith.sitofp %30 : vector<16x128xi32> to vector<16x128xf32>
    %c1_24 = arith.constant 1 : index
    %c0_25 = arith.constant 0 : index
    %32 = vector.load %arg5[%c1_24, %c0_25] : memref<18x128xf32, #tpu.memory_space<vmem>>, vector<16x128xf32>
    tpu.vector_store %arg5[%c1_24, %c0_25], %31 {strides = array<i32>} : memref<18x128xf32, #tpu.memory_space<vmem>>, vector<16x128xf32>,
    %c0_26 = arith.constant 0 : index
    %c0_27 = arith.constant 0 : index
    %33 = vector.load %arg5[%c0_26, %c0_27] : memref<18x128xf32, #tpu.memory_space<vmem>>, vector<16x128xf32>
    %c1_28 = arith.constant 1 : index
    %c0_29 = arith.constant 0 : index
    %34 = vector.load %arg5[%c1_28, %c0_29] : memref<18x128xf32, #tpu.memory_space<vmem>>, vector<16x128xf32>
    %c2_30 = arith.constant 2 : index
    %c0_31 = arith.constant 0 : index
    %35 = vector.load %arg5[%c2_30, %c0_31] : memref<18x128xf32, #tpu.memory_space<vmem>>, vector<16x128xf32>
    %36 = tpu.concatenate %33, %34, %35 in 1 : vector<16x128xf32>, vector<16x128xf32>, vector<16x128xf32> -> vector<16x384xf32>
    %c1_32 = arith.constant 1 : index
    %c0_33 = arith.constant 0 : index
    %c0_34 = arith.constant 0 : index
    %37 = vector.load %arg2[%c1_32, %c0_33, %c0_34] : memref<2x384x128xf32, #tpu.memory_space<vmem>>, vector<1x384x128xf32>
    %38 = vector.shape_cast %37 : vector<1x384x128xf32> to vector<384x128xf32>
    %cst_35 = arith.constant dense<0.000000e+00> : vector<16x128xf32>
    %39 = tpu.matmul %36, %38, %cst_35 {dimension_numbers = #tpu.dot_dimension_numbers<[1], [0], [0], [1], [0, 0, 1, 1], [], []>} : vector<16x384xf32>, vector<384x128xf32>, vector<16x128xf32> -> vector<16x128xf32>
    %c1_36 = arith.constant 1 : index
    %c0_37 = arith.constant 0 : index
    %40 = vector.load %arg3[%c1_36, %c0_37] : memref<2x128xf32, #tpu.memory_space<vmem>>, vector<1x128xf32>
    %41 = vector.shape_cast %40 : vector<1x128xf32> to vector<128xf32>
    %42 = vector.shape_cast %41 : vector<128xf32> to vector<1x128xf32>
    %43 = vector.broadcast %42 : vector<1x128xf32> to vector<16x128xf32>
    %44 = arith.addf %39, %43 : vector<16x128xf32>
    %45 = arith.addf %44, %11 : vector<16x128xf32>
    %c0_38 = arith.constant 0 : index
    %c0_39 = arith.constant 0 : index
    %c0_40 = arith.constant 0 : index
    %46 = vector.load %arg4[%c0_38, %c0_39, %c0_40] : memref<1x16x128xf32, #tpu.memory_space<vmem>>, vector<1x16x128xf32>
    %47 = vector.shape_cast %46 : vector<1x16x128xf32> to vector<16x128xf32>
    %48 = vector.shape_cast %45 : vector<16x128xf32> to vector<1x16x128xf32>
    tpu.vector_store %arg4[%c0_38, %c0_39, %c0_40], %48 {strides = array<i32>} : memref<1x16x128xf32, #tpu.memory_space<vmem>>, vector<1x16x128xf32>,
    return
  }
  func.func @transform_0(%arg0: i32) -> (i32, i32, i32, i32) {
    %c0_i32 = arith.constant 0 : i32
    %c0_i32_0 = arith.constant 0 : i32
    %c0_i32_1 = arith.constant 0 : i32
    %c0_i32_2 = arith.constant 0 : i32
    return %c0_i32, %arg0, %c0_i32_0, %c0_i32_1 : i32, i32, i32, i32
  }
  func.func @transform_1(%arg0: i32) -> (i32, i32, i32) {
    %c0_i32 = arith.constant 0 : i32
    %c0_i32_0 = arith.constant 0 : i32
    %c0_i32_1 = arith.constant 0 : i32
    %c0_i32_2 = arith.constant 0 : i32
    return %c0_i32, %c0_i32_0, %c0_i32_1 : i32, i32, i32
  }
  func.func @transform_2(%arg0: i32) -> (i32, i32) {
    %c0_i32 = arith.constant 0 : i32
    %c0_i32_0 = arith.constant 0 : i32
    %c0_i32_1 = arith.constant 0 : i32
    return %c0_i32, %c0_i32_0 : i32, i32
  }
  func.func @transform_3(%arg0: i32) -> (i32, i32, i32) {
    %c0_i32 = arith.constant 0 : i32
    %c0_i32_0 = arith.constant 0 : i32
    %c0_i32_1 = arith.constant 0 : i32
    return %arg0, %c0_i32, %c0_i32_0 : i32, i32, i32
  }
}

</mosaic_0001>

<bundles_post_ra>
// kernel: tpu_custom_call.1
= control target key start
LH: loop header
LB: loop body
LE: loop exit
PB: predicated region body
PF: predicated region fallthrough
CT: control target
= control target key end

     0   :  { %8 = vsyncpa [#allocation4], 0  ;;  %s1193_s0 = inlined_call_operand.hbm [shape: f32[4,2,16,128], index: 0, kind: input, shape index: {}]   ;;  %s1194_s1 = inlined_call_operand.hbm [shape: f32[2,384,128], index: 1, kind: input, shape index: {}]   ;;  %s1195_s2 = inlined_call_operand.hbm [shape: f32[2,128], index: 2, kind: input, shape index: {}]   ;;  %s1196_s3 = inlined_call_operand.hbm [shape: f32[2,16,128], index: 3, kind: output, shape index: {}]  }
   0x1   :  { %10 = vsyncpa [#allocation4 + $0x1], 0 }
   0x2   :  { %11 = vsyncpa [#allocation7], 0 }
   0x3   :  { %12 = vsyncpa [#allocation5], 0 }
   0x4   :  { %14 = vsyncpa [#allocation5 + $0x1], 0  ;;  %s984_s12 = smov 0   ;;  %s986_s13 = smov 0  }
   0x5   :  { %s988_s14 = smov 0   ;;  %s990_s15 = smov 0  }
   0x6 LB: > { %s1005_s16 = sadd.s32 4294967295, %s948_s15   ;;  %s670_s17 = sadd.s32 4294967294, %s948_s15   ;;  %s948_s15 = sphi %s990_s15, %s1205_s15   ;;  %s944_s14 = sphi %s988_s14, %s1204_s14   ;;  %s940_s13 = sphi %s986_s13, %s1203_s13   ;;  %s936_s12 = sphi %s984_s12, %s1202_s12  }
   0x7   : > { %s1009_s18 = sadd.s32 1, %s948_s15   ;;  %s27_s19 = sadd.s32 1, %s944_s14 }
   0x8   : > { %s24_s20 = ssub.s32 %s948_s15, %s1009_s18  ;;  %p34_p0 = scmp.ne.s32.totalorder %s944_s14, %s940_s13 }
   0x9   : > { %p25_p1 = scmp.eq.s32.totalorder %s24_s20, 0  ;;  %p35_p2 = scmp.eq.s32.totalorder %s948_s15, 0 }
   0xa   : > { %p40_p3 = scmp.ne.s32.totalorder %s940_s13, %s936_s12  ;;  %p41_p4 = scmp.eq.s32.totalorder %s1005_s16, 0 }
   0xb   : > { %s1021_s21 = scalar_select %p25_p1, %s944_s14, %s27_s19  }
   0xc   : > { %p1023_p5 = por %p35_p2, %p34_p0  ;;  %p1029_p6 = por %p41_p4, %p40_p3 }
   0xd   : > { %p106_p7 = scmp.eq.s32.totalorder %s1005_s16, 1  ;;  %p112_p8 = scmp.eq.s32.totalorder %s670_s17, 1 }
   0xe   : > { %p671_p9 = scmp.ge.s32.totalorder %s948_s15, 1  ;;  %p119_p10 = scmp.lt.s32.totalorder %s948_s15, 3 }
   0xf   : > { %p1036_p11 = por %p106_p7, %p34_p0  ;;  %p1040_p12 = por %p112_p8, %p40_p3 }
  0x10   : > { %p1044_p13 = pnand %p671_p9, %p119_p10  ;;  %s130_s29 = sshll.u32 %s1194_s1, 4  ;;  %s131_s29 = int_to_ptr.hbm [resolvable:$true] %s130_s29 }
  0x11   : > { %s950_s30 = smov [#allocation6]   ;;  %s145_s7 = sshll.u32 %s1195_s2, 4  ;;  %s146_s7 = int_to_ptr.hbm [resolvable:$true] %s145_s7 }
  0x12   : > { %p753_p1 = pneg %p1044_p13  ;;  %s132_s4 = sshll.u32 %s950_s30, 4  ;;  %s133_s4 = int_to_ptr.vmem [resolvable:$true] %s132_s4 }
  0x13   : > { %s951_s8 = smov 128   ;;  %s952_s9 = smov 8  }
  0x14   : > { %p754_p0 = pnand %p753_p1, %p41_p4  ;;  %s953_s10 = smov [#allocation8]  }
  0x15   : > { %s147_s11 = sshll.u32 %s953_s10, 4  ;;  %p674_p2 = scmp.ge.s32.totalorder %s948_s15, 2  ;;  %s148_s11 = int_to_ptr.vmem [resolvable:$true] %s147_s11 }
  0x16   : > { %756 = dma.hbm_to_vmem [thread:$0]  (!%p754_p0), %s131_s29, 12288, %s133_s4, [#allocation7], %s951_s8, %s951_s8, %s952_s9  }
  0x17   : > { %759 = dma.hbm_to_vmem [thread:$0]  (!%p754_p0), %s146_s7, 32, %s148_s11, [#allocation7]  }
  0x18   : > { %154 = sbr.rel (%p674_p2) target bundleno = 43 (0x2b), region = 24 }
  0x1d   : > { %s158_s17 = sand.u32 1, %s944_s14   ;;  %s700_s19 = sshll.u32 %s948_s15, 4 }
  0x1e   : > { %s675_s20 = sshll.u32 %s158_s17, 6  ;;  %s167_s29 = scalar_lea.hbm %s1193_s0, %s700_s19 }
  0x1f   : > { %s738_s30 = scalar_select %p1023_p5, [#allocation0], [#allocation12] }
  0x20   : > { %s180_s4 = sshll.u32 %s167_s29, 4  ;;  %s162_s5 = scalar_lea.vmem [#allocation3], %s675_s20  ;;  %s181_s4 = int_to_ptr.hbm [resolvable:$true] %s180_s4 }
  0x21   : > { %s182_s6 = sshll.u32 %s162_s5, 4  ;;  %s172_s7 = sld [smem:[%s738_s30]]   ;;  %s183_s6 = int_to_ptr.vmem [resolvable:$true] %s182_s6 }
  0x22   : > { %s954_s8 = smov 512   ;;  %s955_s9 = smov 256  }
  0x23   : > { %739 = sst [smem:[#allocation11]] (%p1023_p5), %s954_s8  ;;  %s956_s10 = smov 2  }
  0x24   : > { %740 = sst [smem:[#allocation11 + $0x1]] (%p1023_p5), %s955_s9  ;;  %s957_s11 = smov 128  }
  0x25   : > { %741 = sst [smem:[#allocation11 + $0x2]] (%p1023_p5), %s956_s10  ;;  %s958_s27 = smov 8  }
  0x26   : > { %742 = sst [smem:[#allocation11 + $0x3]] (%p1023_p5), %s957_s11  ;;  %s159_s28 = scalar_lea.sflag [#allocation4], %s158_s17 }
  0x27   : > { %s678_s19 = sshll.u32 %s172_s7, 26  ;;  %743 = sst [smem:[#allocation11 + $0x4]] (%p1023_p5), %s957_s11 }
  0x28   : > { %s679_s20 = sadd.s32 134217728, %s678_s19  ;;  %744 = sst [smem:[#allocation11 + $0x5]] (%p1023_p5), %s958_s27 }
  0x29   : > { %s959_s29 = smov [#allocation10]  }
  0x2a   : > { %745 = dma.general (%p1023_p5), %s181_s4, 1024, %s183_s6, %s159_s28, %s959_s29, [#allocation11], %s679_s20, 0  }
  0x2b PF: > { %207 = sbr.rel (%p1044_p13) target bundleno = 387 (0x183), region = 32  ;;  %s1085_s30 = sand.u32 (!%p1044_p13), 1, %s940_s13  }
  0x2c   : > { %s681_s5 = sshll.u32 (!%p1044_p13), %s1085_s30, 6  ;;  %s210_s7 = scalar_lea.sflag (!%p1044_p13), [#allocation4], %s1085_s30 }
  0x2d   : > { %s1089_s8 = scalar_lea.vmem (!%p1044_p13), [#allocation3], %s681_s5 }
  0x30   : > { %923 = dma.done.wait (%p1029_p6), %s210_s7, 1024  }
  0x31   : > { %925 = vsyncadd (%p1029_p6), %s210_s7, 4294966272 }
  0x32   : > { %927 = dma.done.wait (%p41_p4), [#allocation7], 12320  }
  0x33   : > { %929 = vsyncadd (%p41_p4), [#allocation7], 4294954976  ;;  %v960_v0 = vmov 0.0   ;;  %v352_v1 = vld [vmem:[#allocation6 + $0x178] sm:$0xff]  ;;  %v351_v3 = vld [vmem:[#allocation6 + $0x170] sm:$0xff]  ;;  %s684_s22 = sshll.u32 %s1085_s30, 4 }
  0x34   : > { %295 = vst [vmem:[#allocation2] sm:$0x1] %v960_v0  ;;  %v320_v2 = vld [vmem:[#allocation6 + $0x78] sm:$0xff]  ;;  %401 = vmatpush.msra.mxu2 %v352_v1  ;;  %v319_v4 = vld [vmem:[#allocation6 + $0x70] sm:$0xff]  ;;  %v350_v6 = vld [vmem:[#allocation6 + $0x168] sm:$0xff]  ;;  %s246_s23 = scalar_lea.vmem [#allocation9], %s684_s22 }
  0x35   : > { %296 = vst [vmem:[#allocation2 + $0x11] sm:$0x1] %v960_v0  ;;  %355 = vmatpush.msra.mxu0 %v320_v2  ;;  %v336_v5 = vld [vmem:[#allocation6 + $0xf8] sm:$0xff]  ;;  %v318_v7 = vld [vmem:[#allocation6 + $0x68] sm:$0xff]  ;;  %v335_v8 = vld [vmem:[#allocation6 + $0xf0] sm:$0xff]  ;;  %s701_s26 = sshll.u32 %s1005_s16, 4 }
  0x36   : > { %378 = vmatpush.msra.mxu1 %v336_v5  ;;  %402 = vmatpush.msra.mxu2 %v351_v3  ;;  %v334_v9 = vld [vmem:[#allocation6 + $0xe8] sm:$0xff]  ;;  %v349_v10 = vld [vmem:[#allocation6 + $0x160] sm:$0xff]  ;;  %v348_v13 = vld [vmem:[#allocation6 + $0x158] sm:$0xff]  ;;  %s574_s6 = scalar_lea.hbm %s1196_s3, %s701_s26  ;;  %s575_s9 = sshll.u32 %s246_s23, 4  ;;  %s576_s9 = int_to_ptr.vmem [resolvable:$true] %s575_s9 }
  0x37   : > { %356 = vmatpush.msra.mxu0 %v319_v4  ;;  %v317_v11 = vld [vmem:[#allocation6 + $0x60] sm:$0xff]  ;;  %v316_v14 = vld [vmem:[#allocation6 + $0x58] sm:$0xff]  ;;  %v347_v16 = vld [vmem:[#allocation6 + $0x150] sm:$0xff]  ;;  %s577_s10 = sshll.u32 %s574_s6, 4  ;;  %s563_s16 = scalar_lea.sflag [#allocation5], %s1085_s30  ;;  %s578_s10 = int_to_ptr.hbm [resolvable:$true] %s577_s10 }
  0x38   : > { %379 = vmatpush.msra.mxu1 %v335_v8  ;;  %403 = vmatpush.msra.mxu2 %v350_v6  ;;  %v333_v12 = vld [vmem:[#allocation6 + $0xe0] sm:$0xff]  ;;  %v332_v15 = vld [vmem:[#allocation6 + $0xd8] sm:$0xff]  ;;  %v315_v17 = vld [vmem:[#allocation6 + $0x50] sm:$0xff]  ;;  %s892_s11 = sshra.s32 %s578_s10, 4  ;;  %s898_s28 = scalar_lea.hbm %s1196_s3, 32  ;;  %s893_s11 = int_to_ptr.hbm [resolvable:$true] %s892_s11 }
  0x39   : > { %357 = vmatpush.msra.mxu0 %v318_v7  ;;  %v331_v18 = vld [vmem:[#allocation6 + $0xd0] sm:$0xff]  ;;  %v346_v19 = vld [vmem:[#allocation6 + $0x148] sm:$0xff]  ;;  %v345_v22 = vld [vmem:[#allocation6 + $0x140] sm:$0xff]  ;;  %s894_s19 = scalar_lea.hbm %s893_s11, 16  ;;  %p899_p6 = scmp.lt.s32.totalorder %s893_s11, %s1196_s3 }
  0x3a   : > { %380 = vmatpush.msra.mxu1 %v334_v9  ;;  %404 = vmatpush.msra.mxu2 %v349_v10  ;;  %v314_v20 = vld [vmem:[#allocation6 + $0x48] sm:$0xff]  ;;  %v313_v23 = vld [vmem:[#allocation6 + $0x40] sm:$0xff]  ;;  %v344_v24 = vld [vmem:[#allocation6 + $0x138] sm:$0xff]  ;;  %p895_p3 = scmp.ne.s32.totalorder %s893_s11, %s894_s19  ;;  %p900_p7 = scmp.lt.s32.totalorder %s898_s28, %s894_s19 }
  0x3b   : > { %358 = vmatpush.msra.mxu0 %v317_v11  ;;  %v330_v21 = vld [vmem:[#allocation6 + $0xc8] sm:$0xff]  ;;  %v312_v25 = vld [vmem:[#allocation6 + $0x38] sm:$0xff]  ;;  %v329_v26 = vld [vmem:[#allocation6 + $0xc0] sm:$0xff] }
  0x3c   : > { %381 = vmatpush.msra.mxu1 %v333_v12  ;;  %405 = vmatpush.msra.mxu2 %v348_v13  ;;  %v343_v27 = vld [vmem:[#allocation6 + $0x130] sm:$0xff]  ;;  %v328_v29 = vld [vmem:[#allocation6 + $0xb8] sm:$0xff]  ;;  %v1102_v31 = vld [vmem:[%s1089_s8] sm:$0xff]  ;;  %p896_p4 = pnand %p895_p3, %p1036_p11  ;;  %p901_p8 = por %p900_p7, %p899_p6 }
  0x3d   : > { %359 = vmatpush.msra.mxu0 %v316_v14  ;;  %v311_v28 = vld [vmem:[#allocation6 + $0x30] sm:$0xff]  ;;  %v1105_v32 = vld [vmem:[%s1089_s8 + $0x8] sm:$0xff]  ;;  %v1111_v34 = vld [vmem:[%s1089_s8 + $0x18] sm:$0xff]  ;;  %vm255_vm0 = vcmp.ge.f32.partialorder %v1102_v31, 1.0 }
  0x3e   : > { %382 = vmatpush.msra.mxu1 %v332_v15  ;;  %406 = vmatpush.msra.mxu2 %v347_v16  ;;  %v327_v30 = vld [vmem:[#allocation6 + $0xb0] sm:$0xff]  ;;  %v1114_v35 = vld [vmem:[%s1089_s8 + $0x20] sm:$0xff]  ;;  %v1117_v36 = vld [vmem:[%s1089_s8 + $0x28] sm:$0xff]  ;;  %vm256_vm1 = vcmp.ge.f32.partialorder %v1105_v32, 1.0  ;;  %vm258_vm3 = vcmp.ge.f32.partialorder %v1111_v34, 1.0  ;;  %v685_v39 = vsel %vm255_vm0, 1.0, %v960_v0  ;;  %p897_p5 = pneg %p896_p4 }
  0x3f   : > { %360 = vmatpush.msra.mxu0 %v315_v17  ;;  %v1108_v33 = vld [vmem:[%s1089_s8 + $0x10] sm:$0xff]  ;;  %v1126_v38 = vld [vmem:[%s1089_s8 + $0x38] sm:$0xff]  ;;  %vm259_vm4 = vcmp.ge.f32.partialorder %v1114_v35, 1.0  ;;  %vm260_vm5 = vcmp.ge.f32.partialorder %v1117_v36, 1.0  ;;  %v342_v40 = vld [vmem:[#allocation6 + $0x128] sm:$0xff]  ;;  %v686_v42 = vsel %vm256_vm1, 1.0, %v960_v0 }
  0x40   : > { %383 = vmatpush.msra.mxu1 %v331_v18  ;;  %407 = vmatpush.msra.mxu2 %v346_v19  ;;  %vm257_vm2 = vcmp.ge.f32.partialorder %v1108_v33, 1.0  ;;  %v1123_v37 = vld [vmem:[%s1089_s8 + $0x30] sm:$0xff]  ;;  %v310_v41 = vld [vmem:[#allocation6 + $0x28] sm:$0xff]  ;;  %vm262_vm7 = vcmp.ge.f32.partialorder %v1126_v38, 1.0  ;;  %v688_v45 = vsel %vm258_vm3, 1.0, %v960_v0  ;;  %v689_v46 = vsel %vm259_vm4, 1.0, %v960_v0  ;;  %p902_p9 = pnand %p901_p8, %p897_p5 }
  0x41   : > { %361 = vmatpush.msra.mxu0 %v314_v20  ;;  %vm261_vm6 = vcmp.ge.f32.partialorder %v1123_v37, 1.0  ;;  %v687_v43 = vsel %vm257_vm2, 1.0, %v960_v0  ;;  %v326_v44 = vld [vmem:[#allocation6 + $0xa8] sm:$0xff]  ;;  %v690_v47 = vsel %vm260_vm5, 1.0, %v960_v0  ;;  %v454_v48 = vld [vmem:[#allocation6 + $0x1f8] sm:$0xff]  ;;  %v341_v49 = vld [vmem:[#allocation6 + $0x120] sm:$0xff]  ;;  %v282_v52 = vadd.f32 %v688_v45, %v686_v42 }
  0x42   : > { %384 = vmatpush.msra.mxu1 %v330_v21  ;;  %408 = vmatpush.msra.mxu2 %v345_v22  ;;  %v309_v50 = vld [vmem:[#allocation6 + $0x20] sm:$0xff]  ;;  %v279_v51 = vadd.f32 %v687_v43, %v685_v39  ;;  %v453_v53 = vld [vmem:[#allocation6 + $0x1f0] sm:$0xff]  ;;  %v691_v55 = vsel %vm261_vm6, 1.0, %v960_v0  ;;  %v692_v56 = vsel %vm262_vm7, 1.0, %v960_v0  ;;  %v452_v57 = vld [vmem:[#allocation6 + $0x1e8] sm:$0xff] }
  0x43   : > { %362 = vmatpush.msra.mxu0 %v313_v23  ;;  %489 = vmatpush.msra.mxu3 %v454_v48  ;;  %v325_v54 = vld [vmem:[#allocation6 + $0xa0] sm:$0xff]  ;;  %v340_v58 = vld [vmem:[#allocation6 + $0x118] sm:$0xff]  ;;  %v283_v61 = vadd.f32 %v690_v47, %v282_v52  ;;  %v339_v1 = vld [vmem:[#allocation6 + $0x110] sm:$0xff] }
  0x44   : > { %385 = vmatpush.msra.mxu1 %v329_v26  ;;  %409 = vmatpush.msra.mxu2 %v344_v24  ;;  %v308_v59 = vld [vmem:[#allocation6 + $0x18] sm:$0xff]  ;;  %v280_v60 = vadd.f32 %v689_v46, %v279_v51  ;;  %v451_v63 = vld [vmem:[#allocation6 + $0x1e0] sm:$0xff]  ;;  %v307_v2 = vld [vmem:[#allocation6 + $0x10] sm:$0xff] }
  0x45   : > { %363 = vmatpush.msra.mxu0 %v312_v25  ;;  %490 = vmatpush.msra.mxu3 %v453_v53  ;;  %v324_v62 = vld [vmem:[#allocation6 + $0x98] sm:$0xff]  ;;  %v284_v4 = vadd.f32 %v692_v56, %v283_v61  ;;  %v323_v5 = vld [vmem:[#allocation6 + $0x90] sm:$0xff]  ;;  %v338_v7 = vld [vmem:[#allocation6 + $0x108] sm:$0xff] }
  0x46   : > { %386 = vmatpush.msra.mxu1 %v328_v29  ;;  %410 = vmatpush.msra.mxu2 %v343_v27  ;;  %v281_v3 = vadd.f32 %v691_v55, %v280_v60  ;;  %v450_v6 = vld [vmem:[#allocation6 + $0x1d8] sm:$0xff]  ;;  %v306_v8 = vld [vmem:[#allocation6 + $0x8] sm:$0xff]  ;;  %v449_v12 = vld [vmem:[#allocation6 + $0x1d0] sm:$0xff] }
  0x47   : > { %364 = vmatpush.msra.mxu0 %v311_v28  ;;  %491 = vmatpush.msra.mxu3 %v452_v57  ;;  %v286_v10 = vmul.f32 0.25, %v284_v4  ;;  %v322_v11 = vld [vmem:[#allocation6 + $0x88] sm:$0xff]  ;;  %v337_v13 = vld [vmem:[#allocation6 + $0x100] sm:$0xff]  ;;  %v470_v17 = vld [vmem:[#allocation6 + $0x278] sm:$0xff] }
  0x48   : > { %387 = vmatpush.msra.mxu1 %v327_v30  ;;  %411 = vmatpush.msra.mxu2 %v342_v40  ;;  %v285_v9 = vmul.f32 0.25, %v281_v3  ;;  %v305_v14 = vld [vmem:[#allocation6] sm:$0xff]  ;;  %v448_v16 = vld [vmem:[#allocation6 + $0x1c8] sm:$0xff]  ;;  %v469_v19 = vld [vmem:[#allocation6 + $0x270] sm:$0xff] }
  0x49   : > { %365 = vmatpush.msra.mxu0 %v310_v41  ;;  %492 = vmatpush.msra.mxu3 %v451_v63  ;;  %298 = vst [vmem:[#allocation2 + $0x9] sm:$0xff] %v286_v10  ;;  %v321_v15 = vld [vmem:[#allocation6 + $0x80] sm:$0xff]  ;;  %v1145_v20 = vld [vmem:[#allocation6 + $0x2f8] sm:$0xff]  ;;  %v468_v22 = vld [vmem:[#allocation6 + $0x268] sm:$0xff] }
  0x4a   : > { %388 = vmatpush.msra.mxu1 %v326_v44  ;;  %412 = vmatpush.msra.mxu2 %v341_v49  ;;  %297 = vst [vmem:[#allocation2 + $0x1] sm:$0xff] %v285_v9  ;;  %v447_v18 = vld [vmem:[#allocation6 + $0x1c0] sm:$0xff]  ;;  %v446_v21 = vld [vmem:[#allocation6 + $0x1b8] sm:$0xff]  ;;  %v445_v24 = vld [vmem:[#allocation6 + $0x1b0] sm:$0xff] }
  0x4b   : > { %366 = vmatpush.msra.mxu0 %v309_v50  ;;  %493 = vmatpush.msra.mxu3 %v450_v6  ;;  %v467_v26 = vld [vmem:[#allocation6 + $0x260] sm:$0xff]  ;;  %v485_v27 = vld [vmem:[#allocation6 + $0x2f0] sm:$0xff]  ;;  %v444_v28 = vld [vmem:[#allocation6 + $0x1a8] sm:$0xff] }
  0x4c   : > { %389 = vmatpush.msra.mxu1 %v325_v54  ;;  %413 = vmatpush.msra.mxu2 %v340_v58  ;;  %v466_v29 = vld [vmem:[#allocation6 + $0x258] sm:$0xff]  ;;  %v443_v30 = vld [vmem:[#allocation6 + $0x1a0] sm:$0xff]  ;;  %v484_v39 = vld [vmem:[#allocation6 + $0x2e8] sm:$0xff] }
  0x4d   : > { %367 = vmatpush.msra.mxu0 %v308_v59  ;;  %494 = vmatpush.msra.mxu3 %v449_v12  ;;  %v465_v40 = vld [vmem:[#allocation6 + $0x250] sm:$0xff]  ;;  %v442_v42 = vld [vmem:[#allocation6 + $0x198] sm:$0xff]  ;;  %v464_v44 = vld [vmem:[#allocation6 + $0x248] sm:$0xff] }
  0x4e   : > { %390 = vmatpush.msra.mxu1 %v324_v62  ;;  %414 = vmatpush.msra.mxu2 %v339_v1  ;;  %v441_v45 = vld [vmem:[#allocation6 + $0x190] sm:$0xff]  ;;  %v440_v46 = vld [vmem:[#allocation6 + $0x188] sm:$0xff]  ;;  %v463_v47 = vld [vmem:[#allocation6 + $0x240] sm:$0xff] }
  0x4f   : > { %368 = vmatpush.msra.mxu0 %v307_v2  ;;  %495 = vmatpush.msra.mxu3 %v448_v16  ;;  %v462_v48 = vld [vmem:[#allocation6 + $0x238] sm:$0xff]  ;;  %v461_v49 = vld [vmem:[#allocation6 + $0x230] sm:$0xff]  ;;  %v460_v50 = vld [vmem:[#allocation6 + $0x228] sm:$0xff] }
  0x50   : > { %391 = vmatpush.msra.mxu1 %v323_v5  ;;  %415 = vmatpush.msra.mxu2 %v338_v7  ;;  %v304_v43 = vld [vmem:[#allocation2 + $0xa] sm:$0xff]  ;;  %v483_v51 = vld [vmem:[#allocation6 + $0x2e0] sm:$0xff]  ;;  %v480_v58 = vld [vmem:[#allocation6 + $0x2c8] sm:$0xff] }
  0x51   : > { %369 = vmatpush.msra.mxu0 %v306_v8  ;;  %496 = vmatpush.msra.mxu3 %v447_v18  ;;  %v299_v23 = vld [vmem:[#allocation2] sm:$0xff]  ;;  %v300_v41 = vld [vmem:[#allocation2 + $0x8] sm:$0xff]  ;;  %v439_v52 = vld [vmem:[#allocation6 + $0x180] sm:$0xff] }
  0x52   : > { %392 = vmatpush.msra.mxu1 %v322_v11  ;;  %416 = vmatpush.msra.mxu2 %v337_v13  ;;  %v303_v25 = vld [vmem:[#allocation2 + $0x2] sm:$0xff]  ;;  %v459_v53 = vld [vmem:[#allocation6 + $0x220] sm:$0xff]  ;;  %v482_v54 = vld [vmem:[#allocation6 + $0x2d8] sm:$0xff] }
  0x53   : > { %370 = vmatpush.msra.mxu0 %v305_v14  ;;  %497 = vmatpush.msra.mxu3 %v446_v21  ;;  %v458_v55 = vld [vmem:[#allocation6 + $0x218] sm:$0xff]  ;;  %v481_v56 = vld [vmem:[#allocation6 + $0x2d0] sm:$0xff]  ;;  %v456_v59 = vld [vmem:[#allocation6 + $0x208] sm:$0xff] }
  0x54   : > { %393 = vmatpush.msra.mxu1 %v321_v15  ;;  %702 = vmatpush.msrb.mxu2 %v470_v17  ;;  %v457_v57 = vld [vmem:[#allocation6 + $0x210] sm:$0xff]  ;;  %v479_v60 = vld [vmem:[#allocation6 + $0x2c0] sm:$0xff]  ;;  %v478_v62 = vld [vmem:[#allocation6 + $0x2b8] sm:$0xff] }
  0x55   : > { %394 = vmatmul.f32.vlgmr.msra.gmra.mxu1 %v285_v9  ;;  %512 = vmatpush.msrb.mxu0 %v470_v17  ;;  %v455_v61 = vld [vmem:[#allocation6 + $0x200] sm:$0xff]  ;;  %v477_v63 = vld [vmem:[#allocation6 + $0x2b0] sm:$0xff]  ;;  %v476_v1 = vld [vmem:[#allocation6 + $0x2a8] sm:$0xff] }
  0x56   : > { %535 = vmatpush.msrb.mxu1 %v1145_v20  ;;  %371 = vmatmul.f32.vlgmr.msra.gmra.mxu0 %v299_v23  ;;  %v475_v2 = vld [vmem:[#allocation6 + $0x2a0] sm:$0xff]  ;;  %v474_v3 = vld [vmem:[#allocation6 + $0x298] sm:$0xff]  ;;  %v473_v4 = vld [vmem:[#allocation6 + $0x290] sm:$0xff] }
  0x57   : > { %513 = vmatpush.msrb.mxu0 %v469_v19  ;;  %417 = vmatmul.f32.vlgmr.msra.gmra.mxu2 %v303_v25  ;;  %v472_v5 = vld [vmem:[#allocation6 + $0x288] sm:$0xff]  ;;  %v471_v6 = vld [vmem:[#allocation6 + $0x280] sm:$0xff] }
  0x58   : > { %498 = vmatpush.msra.mxu3 %v445_v24  ;;  %703 = vmatpush.msrb.mxu2 %v469_v19  ;;  %v814_v7 = vld [vmem:[#allocation8] ss:$0 sm:$0xff]  ;;  %v961_v19 = vmov 1.0  }
  0x59   : > { %514 = vmatpush.msrb.mxu0 %v468_v22  ;;  %536 = vmatpush.msrb.mxu1 %v485_v27 }
  0x5a   : > { %499 = vmatpush.msra.mxu3 %v444_v28  ;;  %704 = vmatpush.msrb.mxu2 %v468_v22 }
  0x5b   : > { %515 = vmatpush.msrb.mxu0 %v467_v26  ;;  %537 = vmatpush.msrb.mxu1 %v484_v39 }
  0x5c   : > { %500 = vmatpush.msra.mxu3 %v443_v30  ;;  %705 = vmatpush.msrb.mxu2 %v467_v26 }
  0x5d   : > { %397 = vmatmul.f32.gmra.mxu1 %v286_v10  ;;  %516 = vmatpush.msrb.mxu0 %v466_v29 }
  0x5e   : > { %374 = vmatmul.f32.gmra.mxu0 %v300_v41  ;;  %501 = vmatpush.msra.mxu3 %v442_v42 }
  0x5f   : > { %517 = vmatpush.msrb.mxu0 %v465_v40  ;;  %420 = vmatmul.f32.gmra.mxu2 %v304_v43  ;;  %v290_v43 = vadd.f32 %v1111_v34, %v1105_v32 }
  0x60   : > { %502 = vmatpush.msra.mxu3 %v441_v45  ;;  %706 = vmatpush.msrb.mxu2 %v466_v29  ;;  %v815_v29 = vld [vmem:[#allocation8 + $0x1] ss:$0 sm:$0xff] }
  0x61   : > { %518 = vmatpush.msrb.mxu0 %v464_v44  ;;  %538 = vmatpush.msrb.mxu1 %v483_v51 }
  0x62   : > { %503 = vmatpush.msra.mxu3 %v440_v46  ;;  %707 = vmatpush.msrb.mxu2 %v465_v40 }
  0x63   : > { %519 = vmatpush.msrb.mxu0 %v463_v47  ;;  %539 = vmatpush.msrb.mxu1 %v482_v54 }
  0x64   : > { %708 = vmatpush.msrb.mxu2 %v464_v44  ;;  %504 = vmatpush.msra.mxu3 %v439_v52 }
  0x65   : > { %520 = vmatpush.msrb.mxu0 %v462_v48  ;;  %540 = vmatpush.msrb.mxu1 %v481_v56 }
  0x66   : > { %709 = vmatpush.msrb.mxu2 %v463_v47  ;;  %718 = vmatpush.msrb.mxu3 %v1145_v20 }
  0x67   : > { %521 = vmatpush.msrb.mxu0 %v461_v49  ;;  %541 = vmatpush.msrb.mxu1 %v480_v58 }
  0x68   : > { %710 = vmatpush.msrb.mxu2 %v462_v48  ;;  %719 = vmatpush.msrb.mxu3 %v485_v27  ;;  %v287_v27 = vadd.f32 %v1108_v33, %v1102_v31  ;;  %v291_v31 = vadd.f32 %v290_v43, %v1117_v36 }
  0x69   : > { %522 = vmatpush.msrb.mxu0 %v460_v50  ;;  %542 = vmatpush.msrb.mxu1 %v479_v60 }
  0x6a   : > { %711 = vmatpush.msrb.mxu2 %v461_v49  ;;  %720 = vmatpush.msrb.mxu3 %v484_v39  ;;  %v288_v28 = vadd.f32 %v287_v27, %v1114_v35 }
  0x6b   : > { %523 = vmatpush.msrb.mxu0 %v459_v53  ;;  %543 = vmatpush.msrb.mxu1 %v478_v62 }
  0x6c   : > { %712 = vmatpush.msrb.mxu2 %v460_v50  ;;  %721 = vmatpush.msrb.mxu3 %v483_v51 }
  0x6d   : > { %524 = vmatpush.msrb.mxu0 %v458_v55  ;;  %544 = vmatpush.msrb.mxu1 %v477_v63 }
  0x6e   : > { %713 = vmatpush.msrb.mxu2 %v459_v53  ;;  %722 = vmatpush.msrb.mxu3 %v482_v54 }
  0x6f   : > { %525 = vmatpush.msrb.mxu0 %v457_v57  ;;  %545 = vmatpush.msrb.mxu1 %v476_v1 }
  0x70   : > { %714 = vmatpush.msrb.mxu2 %v458_v55  ;;  %723 = vmatpush.msrb.mxu3 %v481_v56 }
  0x71   : > { %526 = vmatpush.msrb.mxu0 %v456_v59  ;;  %546 = vmatpush.msrb.mxu1 %v475_v2 }
  0x72   : > { %715 = vmatpush.msrb.mxu2 %v457_v57  ;;  %724 = vmatpush.msrb.mxu3 %v480_v58 }
  0x73   : > { %527 = vmatpush.msrb.mxu0 %v455_v61  ;;  %547 = vmatpush.msrb.mxu1 %v474_v3 }
  0x74   : > { %716 = vmatpush.msrb.mxu2 %v456_v59  ;;  %725 = vmatpush.msrb.mxu3 %v479_v60 }
  0x75   : > { %548 = vmatpush.msrb.mxu1 %v473_v4 }
  0x76   : > { %717 = vmatpush.msrb.mxu2 %v455_v61  ;;  %726 = vmatpush.msrb.mxu3 %v478_v62 }
  0x77   : > { %549 = vmatpush.msrb.mxu1 %v472_v5 }
  0x78   : > { %727 = vmatpush.msrb.mxu3 %v477_v63 }
  0x79   : > { %550 = vmatpush.msrb.mxu1 %v471_v6 }
  0x7a   : > { %728 = vmatpush.msrb.mxu3 %v476_v1 }
  0x7c   : > { %729 = vmatpush.msrb.mxu3 %v475_v2 }
  0x7e   : > { %730 = vmatpush.msrb.mxu3 %v474_v3 }
  0x80   : > { %731 = vmatpush.msrb.mxu3 %v473_v4 }
  0x82   : > { %732 = vmatpush.msrb.mxu3 %v472_v5 }
  0x84   : > { %733 = vmatpush.msrb.mxu3 %v471_v6 }
  0xd2   : > { %v395_v8 = vpop.f32.mrf.mxu1 }
  0xd3   : > { %v372_v9 = vpop.f32.mrf.mxu0 }
  0xd4   : > { %v373_v10 = vadd.f32 %v814_v7, %v372_v9 }
  0xd6   : > { %v396_v11 = vadd.f32 %v395_v8, %v373_v10 }
  0xda   : > { %v418_v12 = vpop.f32.mrf.mxu2  ;;  %v398_v16 = vpop.f32.mrf.mxu1 }
  0xdb   : > { %v419_v13 = vadd.f32 %v418_v12, %v396_v11  ;;  %v375_v14 = vpop.f32.mrf.mxu0 }
  0xdc   : > { %v376_v15 = vadd.f32 %v814_v7, %v375_v14 }
  0xdd   : > { %vm424_vm8 = vcmp.ge.f32.partialorder %v419_v13, 1.0 }
  0xde   : > { %v693_v17 = vsel %vm424_vm8, 1.0, %v960_v0  ;;  %v399_v18 = vadd.f32 %v398_v16, %v376_v15  ;;  %816 = vmatmul.msk.f32.vlgmr.msrb.gmra.mxu0 %vm424_vm8, %v961_v19 }
  0xdf   : > { %430 = vst [vmem:[#allocation2 + $0x1] sm:$0xff] %v693_v17 }
  0xe2   : > { %v421_v20 = vpop.f32.mrf.mxu2 }
  0xe3   : > { %v422_v21 = vadd.f32 %v421_v20, %v399_v18 }
  0xe5   : > { %vm425_vm9 = vcmp.ge.f32.partialorder %v422_v21, 1.0 }
  0xe6   : > { %v694_v22 = vsel %vm425_vm9, 1.0, %v960_v0  ;;  %v432_v23 = vld [vmem:[#allocation2] sm:$0xff]  ;;  %817 = vmatmul.msk.f32.vlgmr.msrb.gmra.mxu2 %vm425_vm9, %v961_v19  ;;  %v289_v0 = vadd.f32 %v288_v28, %v1123_v37  ;;  %v292_v37 = vadd.f32 %v291_v31, %v1126_v38 }
  0xe7   : > { %431 = vst [vmem:[#allocation2 + $0x9] sm:$0xff] %v694_v22  ;;  %505 = vmatmul.f32.vlgmr.msra.gmra.mxu3 %v432_v23 }
  0xe8   : > { %v293_v41 = vmul.f32 0.25, %v289_v0  ;;  %v294_v47 = vmul.f32 0.25, %v292_v37 }
  0xee   : > { %v433_v24 = vld [vmem:[#allocation2 + $0x8] sm:$0xff] }
  0xef   : > { %v436_v25 = vld [vmem:[#allocation2 + $0x2] sm:$0xff]  ;;  %508 = vmatmul.f32.gmra.mxu3 %v433_v24  ;;  %v437_v26 = vld [vmem:[#allocation2 + $0xa] sm:$0xff] }
  0xf0   : > { %551 = vmatmul.f32.vlgmr.msrb.gmra.mxu1 %v436_v25 }
  0xf7   : > { %554 = vmatmul.f32.vlgmr.msrb.gmra.mxu3 %v437_v26 }
 0x15b   : > { %v529_v40 = vpop.f32.mrf.mxu0 }
 0x169   : > { %v532_v32 = vpop.f32.mrf.mxu2 }
 0x16a   : > { %v506_v30 = vpop.f32.mrf.mxu3 }
 0x16b   : > { %v507_v39 = vadd.f32 %v815_v29, %v506_v30 }
 0x16d   : > { %v530_v42 = vadd.f32 %v529_v40, %v507_v39  ;;  %v552_v44 = vpop.f32.mrf.mxu1 }
 0x16f   : > { %v553_v45 = vadd.f32 %v552_v44, %v530_v42 }
 0x171   : > { %v558_v46 = vadd.f32 %v553_v45, %v293_v41 }
 0x172   : > { %v509_v33 = vpop.f32.mrf.mxu3 }
 0x173   : > { %560 = vst [vmem:[%s246_s23] sm:$0xff] %v558_v46  ;;  %v510_v35 = vadd.f32 %v815_v29, %v509_v33 }
 0x175   : > { %v533_v34 = vadd.f32 %v532_v32, %v510_v35 }
 0x17a   : > { %v555_v48 = vpop.f32.mrf.mxu3 }
 0x17b   : > { %v556_v36 = vadd.f32 %v555_v48, %v533_v34 }
 0x17d   : > { %v559_v49 = vadd.f32 %v556_v36, %v294_v47 }
 0x17f   : > { %561 = vst [vmem:[%s246_s23 + $0x8] sm:$0xff] %v559_v49 }
 0x180   : > { %905 = shalt.err (!%p902_p9)
}
 0x181   : > { %s962_s30 = smov 128   ;;  %s963_s7 = smov 8  }
 0x182   : > { %751 = dma.vmem_to_hbm [thread:$0]  (%p1036_p11), %s576_s9, 256, %s578_s10, %s563_s16, %s962_s30, %s962_s30, %s963_s7  }
 0x183 PF: > { %s592_s8 = sand.u32 1, %s936_s12   ;;  %p761_p10 = pnand %p674_p2, %p1040_p12 }
 0x184   : > { %s593_s22 = scalar_lea.sflag [#allocation5], %s592_s8 }
 0x185   : > { %p762_p13 = pneg %p761_p10 }
 0x187   : > { %931 = dma.done.wait (%p762_p13), %s593_s22, 256  }
 0x188   : > { %933 = vsyncadd (%p762_p13), %s593_s22, 4294967040  ;;  %p17_p1 = scmp.ge.s32.totalorder %s1009_s18, 4   ;;  %s1202_s12 = smov %s940_s13 }
 0x189   : > { %s1203_s13 = smov %s944_s14  ;;  %s1204_s14 = smov %s1021_s21 }
 0x18a   : > { %s1205_s15 = smov %s1009_s18  ;;  %19 = sbr.rel (!%p17_p1) target bundleno = 6 (0x6), region = 91 }
 0x18f   :  { %599 = vsyncpa [#allocation4], 1 }
 0x190   :  { %601 = vsyncpa [#allocation4 + $0x1], 1 }
 0x191   :  { %602 = vsyncpa [#allocation7], 1 }
 0x192   :  { %603 = vsyncpa [#allocation5], 1 }
 0x193   :  { %605 = vsyncpa [#allocation5 + $0x1], 1 }

</bundles_post_ra>
